<compile_context>
chip_gen: v7x
topology: tpu7x:2x2x1
jax: 0.10.0
libtpu: 0.0.40
codegen_flags: <defaults>
</compile_context>

<pallas_src>
import jax
import jax.numpy as jnp
from jax.experimental import pallas as pl
from jax.experimental.pallas import tpu as pltpu


def _round_up(n, m):
    return ((n + m - 1) // m) * m


def _score_predictor_residual_kernel(x_ref, w1_ref, b1_ref, w2_ref, b2_ref,
                                     w3r_ref, w3c_ref, b3_ref, o_ref):
    x = x_ref[...]                                   # (TB, F) batch-major tile

    # lin1 + ReLU : contract F of W1 (2F, F) with F of x (TB, F) -> (2F, TB).
    # Activations come out transposed (batch on lanes) with no explicit x^T.
    z1 = jax.lax.dot_general(w1_ref[...], x, (((1,), (1,)), ((), ())),
                             preferred_element_type=jnp.float32) + b1_ref[...]
    h1 = jnp.maximum(z1, 0.0)

    # lin2 + ReLU : (F, 2F) @ (2F, TB) -> (F, TB)                      [MXU]
    z2 = jnp.dot(w2_ref[...], h1,
                 preferred_element_type=jnp.float32) + b2_ref[...]
    r2 = jnp.maximum(z2, 0.0)

    # Head with the residual folded in:
    #   logits = w3 · relu(z2)            (VPU mul + sublane reduce, (1, TB))
    #          + w3 · x                   (tiny (1,F)x(TB,F) MXU pass, (1, TB))
    #          + b3                       (scalar from SMEM)
    head_relu = jnp.sum(r2 * w3c_ref[...], axis=0, keepdims=True)
    head_res = jax.lax.dot_general(w3r_ref[...], x, (((1,), (1,)), ((), ())),
                                   preferred_element_type=jnp.float32)
    logits = head_relu + head_res + b3_ref[0, 0]

    # sigmoid(x) == 0.5 * tanh(0.5 * x) + 0.5  -> single EUP op.
    o_ref[...] = (0.5 * jnp.tanh(0.5 * logits) + 0.5).astype(o_ref.dtype)


def score_predictor_residual(x, w1, b1, w2, b2, w3, b3, *, tb=4096):
    """x: (B, F) f32.  Weights in PyTorch nn.Linear layout:
       w1 (2F, F), b1 (2F,), w2 (F, 2F), b2 (F,), w3 (1, F), b3 (1,).
       Returns (B, 1) f32."""
    B, F = x.shape
    H = 2 * F
    assert w1.shape == (H, F) and b1.shape == (H,)
    assert w2.shape == (F, H) and b2.shape == (F,)
    assert w3.shape == (1, F) and b3.shape == (1,)

    # Batch-tile selection (no jnp.pad anywhere):
    #   * B < 128  -> one full-array block (block dims == array dims).
    #   * B >= 128 -> multiple of 128, <= B, clamped to the requested tb;
    #                 for B >= 256 enforce >= 2 grid steps so both v7x
    #                 TensorCores get work.  Ragged final block handled by
    #                 Pallas edge masking (compute is per-lane independent).
    if B < 128:
        tb_eff = B
    else:
        tb_eff = max(128, min(tb, (B // 128) * 128))
        if B >= 256:
            tb_eff = min(tb_eff, _round_up(pl.cdiv(B, 2), 128))
    grid = (pl.cdiv(B, tb_eff),)

    # Biases / head weight as columns (broadcast over the lane/batch axis),
    # head weight also as a row for the residual contraction, b3 as SMEM scalar.
    b1c = b1.reshape(H, 1)
    b2c = b2.reshape(F, 1)
    w3c = w3.reshape(F, 1)
    b3s = b3.reshape(1, 1).astype(jnp.float32)

    flops = 2 * B * (F * H + H * F + 2 * F)           # two GEMMs + two heads
    bytes_accessed = 4 * (B * F + B + H * F + H + F * H + F + 2 * F + 1)
    cost = pl.CostEstimate(flops=int(flops), bytes_accessed=int(bytes_accessed),
                           transcendentals=int(B))

    out_row = pl.pallas_call(
        _score_predictor_residual_kernel,
        out_shape=jax.ShapeDtypeStruct((1, B), x.dtype),
        grid_spec=pl.GridSpec(
            grid=grid,
            in_specs=[
                pl.BlockSpec((tb_eff, F), lambda i: (i, 0)),   # x tile
                pl.BlockSpec((H, F), lambda i: (0, 0)),        # W1 (resident)
                pl.BlockSpec((H, 1), lambda i: (0, 0)),        # b1 column
                pl.BlockSpec((F, H), lambda i: (0, 0)),        # W2
                pl.BlockSpec((F, 1), lambda i: (0, 0)),        # b2 column
                pl.BlockSpec((1, F), lambda i: (0, 0)),        # w3 row
                pl.BlockSpec((F, 1), lambda i: (0, 0)),        # w3 column
                pl.BlockSpec(memory_space=pltpu.MemorySpace.SMEM),  # b3 scalar
            ],
            out_specs=pl.BlockSpec((1, tb_eff), lambda i: (0, i)),  # lane-dense
        ),
        compiler_params=pltpu.CompilerParams(
            dimension_semantics=("parallel",)),
        cost_estimate=cost,
    )(x, w1, b1c, w2, b2c, w3, w3c, b3s)

    return out_row[0, :].reshape(B, 1)


def _reference(x, w1, b1, w2, b2, w3, b3):
    h1 = jax.nn.relu(x @ w1.T + b1)
    h2 = jax.nn.relu(h1 @ w2.T + b2) + x
    return jax.nn.sigmoid(h2 @ w3.T + b3)


if __name__ == "__main__":
    B, F = 16, 32            # batch, feature_dim
    H = 2 * F

    key = jax.random.PRNGKey(0)
    kx, k1, kb1, k2, kb2, k3, kb3, kx2 = jax.random.split(key, 8)

    x = jax.random.normal(kx, (B, F), dtype=jnp.float32)

    # Deterministic synthetic parameters (PyTorch-Linear-like uniform scale),
    # stored in PyTorch nn.Linear layout (out, in).
    def init(k, fan_in, shape):
        bound = fan_in ** -0.5
        return jax.random.uniform(k, shape, jnp.float32, -bound, bound)

    w1 = init(k1, F, (H, F));  b1 = init(kb1, F, (H,))
    w2 = init(k2, H, (F, H));  b2 = init(kb2, H, (F,))
    w3 = init(k3, F, (1, F));  b3 = init(kb3, F, (1,))

    # Small batch: single full-array block.
    out = score_predictor_residual(x, w1, b1, w2, b2, w3, b3)
    out = jax.block_until_ready(out)
    ref = _reference(x, w1, b1, w2, b2, w3, b3)
    assert out.shape == (B, 1)
    assert jnp.allclose(out, ref, atol=1e-5, rtol=1e-5), "mismatch vs reference"

    # Larger, non-divisible batch: exercises the multi-step grid and the
    # ragged final block (masked edge writes, no jnp.pad).
    B2 = 300
    x2 = jax.random.normal(kx2, (B2, F), dtype=jnp.float32)
    out2 = score_predictor_residual(x2, w1, b1, w2, b2, w3, b3)
    out2 = jax.block_until_ready(out2)
    ref2 = _reference(x2, w1, b1, w2, b2, w3, b3)
    assert out2.shape == (B2, 1)
    assert jnp.allclose(out2, ref2, atol=1e-5, rtol=1e-5), "mismatch (ragged)"

    print("KERNEL_OK")
</pallas_src>

<mosaic_0001>
module attributes {stable_mosaic.version = 11 : i64} {
  func.func @_score_predictor_residual_kernel(%arg0: i32, %arg1: memref<16x32xf32, #tpu.memory_space<vmem>>, %arg2: memref<64x32xf32, #tpu.memory_space<vmem>>, %arg3: memref<64x1xf32, #tpu.memory_space<vmem>>, %arg4: memref<32x64xf32, #tpu.memory_space<vmem>>, %arg5: memref<32x1xf32, #tpu.memory_space<vmem>>, %arg6: memref<1x32xf32, #tpu.memory_space<vmem>>, %arg7: memref<32x1xf32, #tpu.memory_space<vmem>>, %arg8: memref<1x1xf32, #tpu.memory_space<smem>>, %arg9: memref<1x16xf32, #tpu.memory_space<vmem>>) attributes {dimension_semantics = [#tpu.dimension_semantics<parallel>], iteration_bounds = array<i64: 1>, scalar_prefetch = 0 : i64, scratch_operands = 0 : i64, tpu.core_type = #tpu.core_type<tc>, window_params = [{transform_indices = @transform_0, window_bounds = array<i64: 16, 32>}, {pipeline_mode = #tpu.pipeline_mode<synchronous>, transform_indices = @transform_1, window_bounds = array<i64: 64, 32>}, {pipeline_mode = #tpu.pipeline_mode<synchronous>, transform_indices = @transform_2, window_bounds = array<i64: 64, 1>}, {pipeline_mode = #tpu.pipeline_mode<synchronous>, transform_indices = @transform_3, window_bounds = array<i64: 32, 64>}, {pipeline_mode = #tpu.pipeline_mode<synchronous>, transform_indices = @transform_4, window_bounds = array<i64: 32, 1>}, {pipeline_mode = #tpu.pipeline_mode<synchronous>, transform_indices = @transform_5, window_bounds = array<i64: 1, 32>}, {pipeline_mode = #tpu.pipeline_mode<synchronous>, transform_indices = @transform_6, window_bounds = array<i64: 32, 1>}, {transform_indices = @transform_7, window_bounds = array<i64: 1, 1>}, {transform_indices = @transform_8, window_bounds = array<i64: 1, 16>}]} {
    %c0 = arith.constant 0 : index
    %c0_0 = arith.constant 0 : index
    %0 = vector.load %arg1[%c0, %c0_0] : memref<16x32xf32, #tpu.memory_space<vmem>>, vector<16x32xf32>
    %c0_1 = arith.constant 0 : index
    %c0_2 = arith.constant 0 : index
    %1 = vector.load %arg2[%c0_1, %c0_2] : memref<64x32xf32, #tpu.memory_space<vmem>>, vector<64x32xf32>
    %cst = arith.constant dense<0.000000e+00> : vector<64x16xf32>
    %2 = tpu.matmul %1, %0, %cst {dimension_numbers = #tpu.dot_dimension_numbers<[1], [1], [0], [0], [0, 0, 1, 0], [], []>} : vector<64x32xf32>, vector<16x32xf32>, vector<64x16xf32> -> vector<64x16xf32>
    %c0_3 = arith.constant 0 : index
    %c0_4 = arith.constant 0 : index
    %3 = vector.load %arg3[%c0_3, %c0_4] : memref<64x1xf32, #tpu.memory_space<vmem>>, vector<64x1xf32>
    %4 = vector.broadcast %3 : vector<64x1xf32> to vector<64x16xf32>
    %5 = arith.addf %2, %4 : vector<64x16xf32>
    %cst_5 = arith.constant 0.000000e+00 : f32
    %6 = vector.broadcast %cst_5 : f32 to vector<64x16xf32>
    %7 = arith.maximumf %5, %6 : vector<64x16xf32>
    %c0_6 = arith.constant 0 : index
    %c0_7 = arith.constant 0 : index
    %8 = vector.load %arg4[%c0_6, %c0_7] : memref<32x64xf32, #tpu.memory_space<vmem>>, vector<32x64xf32>
    %cst_8 = arith.constant dense<0.000000e+00> : vector<32x16xf32>
    %9 = tpu.matmul %8, %7, %cst_8 {dimension_numbers = #tpu.dot_dimension_numbers<[1], [0], [0], [1], [0, 0, 1, 1], [], []>} : vector<32x64xf32>, vector<64x16xf32>, vector<32x16xf32> -> vector<32x16xf32>
    %c0_9 = arith.constant 0 : index
    %c0_10 = arith.constant 0 : index
    %10 = vector.load %arg5[%c0_9, %c0_10] : memref<32x1xf32, #tpu.memory_space<vmem>>, vector<32x1xf32>
    %11 = vector.broadcast %10 : vector<32x1xf32> to vector<32x16xf32>
    %12 = arith.addf %9, %11 : vector<32x16xf32>
    %cst_11 = arith.constant 0.000000e+00 : f32
    %13 = vector.broadcast %cst_11 : f32 to vector<32x16xf32>
    %14 = arith.maximumf %12, %13 : vector<32x16xf32>
    %c0_12 = arith.constant 0 : index
    %c0_13 = arith.constant 0 : index
    %15 = vector.load %arg7[%c0_12, %c0_13] : memref<32x1xf32, #tpu.memory_space<vmem>>, vector<32x1xf32>
    %16 = vector.broadcast %15 : vector<32x1xf32> to vector<32x16xf32>
    %17 = arith.mulf %14, %16 : vector<32x16xf32>
    %cst_14 = arith.constant dense<0.000000e+00> : vector<16xf32>
    %18 = vector.multi_reduction <add>, %17, %cst_14 [0] : vector<32x16xf32> to vector<16xf32>
    %19 = vector.shape_cast %18 : vector<16xf32> to vector<1x16xf32>
    %c0_15 = arith.constant 0 : index
    %c0_16 = arith.constant 0 : index
    %20 = vector.load %arg6[%c0_15, %c0_16] : memref<1x32xf32, #tpu.memory_space<vmem>>, vector<1x32xf32>
    %cst_17 = arith.constant dense<0.000000e+00> : vector<1x16xf32>
    %21 = tpu.matmul %20, %0, %cst_17 {dimension_numbers = #tpu.dot_dimension_numbers<[1], [1], [0], [0], [0, 0, 1, 0], [], []>} : vector<1x32xf32>, vector<16x32xf32>, vector<1x16xf32> -> vector<1x16xf32>
    %22 = arith.addf %19, %21 : vector<1x16xf32>
    %c0_18 = arith.constant 0 : index
    %c0_19 = arith.constant 0 : index
    %23 = memref.load %arg8[%c0_18, %c0_19] : memref<1x1xf32, #tpu.memory_space<smem>>
    %24 = vector.broadcast %23 : f32 to vector<1x16xf32>
    %25 = arith.addf %22, %24 : vector<1x16xf32>
    %cst_20 = arith.constant 5.000000e-01 : f32
    %26 = vector.broadcast %cst_20 : f32 to vector<1x16xf32>
    %27 = arith.mulf %26, %25 : vector<1x16xf32>
    %28 = math.tanh %27 : vector<1x16xf32>
    %cst_21 = arith.constant 5.000000e-01 : f32
    %29 = vector.broadcast %cst_21 : f32 to vector<1x16xf32>
    %30 = arith.mulf %29, %28 : vector<1x16xf32>
    %cst_22 = arith.constant 5.000000e-01 : f32
    %31 = vector.broadcast %cst_22 : f32 to vector<1x16xf32>
    %32 = arith.addf %30, %31 : vector<1x16xf32>
    %c0_23 = arith.constant 0 : index
    %c0_24 = arith.constant 0 : index
    %33 = vector.load %arg9[%c0_23, %c0_24] : memref<1x16xf32, #tpu.memory_space<vmem>>, vector<1x16xf32>
    tpu.vector_store %arg9[%c0_23, %c0_24], %32 {strides = array<i32>} : memref<1x16xf32, #tpu.memory_space<vmem>>, vector<1x16xf32>,
    return
  }
  func.func @transform_0(%arg0: i32) -> (i32, i32) {
    %c0_i32 = arith.constant 0 : i32
    %c0_i32_0 = arith.constant 0 : i32
    return %arg0, %c0_i32 : i32, i32
  }
  func.func @transform_1(%arg0: i32) -> (i32, i32) {
    %c0_i32 = arith.constant 0 : i32
    %c0_i32_0 = arith.constant 0 : i32
    %c0_i32_1 = arith.constant 0 : i32
    return %c0_i32, %c0_i32_0 : i32, i32
  }
  func.func @transform_2(%arg0: i32) -> (i32, i32) {
    %c0_i32 = arith.constant 0 : i32
    %c0_i32_0 = arith.constant 0 : i32
    %c0_i32_1 = arith.constant 0 : i32
    return %c0_i32, %c0_i32_0 : i32, i32
  }
  func.func @transform_3(%arg0: i32) -> (i32, i32) {
    %c0_i32 = arith.constant 0 : i32
    %c0_i32_0 = arith.constant 0 : i32
    %c0_i32_1 = arith.constant 0 : i32
    return %c0_i32, %c0_i32_0 : i32, i32
  }
  func.func @transform_4(%arg0: i32) -> (i32, i32) {
    %c0_i32 = arith.constant 0 : i32
    %c0_i32_0 = arith.constant 0 : i32
    %c0_i32_1 = arith.constant 0 : i32
    return %c0_i32, %c0_i32_0 : i32, i32
  }
  func.func @transform_5(%arg0: i32) -> (i32, i32) {
    %c0_i32 = arith.constant 0 : i32
    %c0_i32_0 = arith.constant 0 : i32
    %c0_i32_1 = arith.constant 0 : i32
    return %c0_i32, %c0_i32_0 : i32, i32
  }
  func.func @transform_6(%arg0: i32) -> (i32, i32) {
    %c0_i32 = arith.constant 0 : i32
    %c0_i32_0 = arith.constant 0 : i32
    %c0_i32_1 = arith.constant 0 : i32
    return %c0_i32, %c0_i32_0 : i32, i32
  }
  func.func @transform_7(%arg0: i32) -> (i32, i32) {
    %c0_i32 = arith.constant 0 : i32
    %c0_i32_0 = arith.constant 0 : i32
    %c0_i32_1 = arith.constant 0 : i32
    return %c0_i32, %c0_i32_0 : i32, i32
  }
  func.func @transform_8(%arg0: i32) -> (i32, i32) {
    %c0_i32 = arith.constant 0 : i32
    %c0_i32_0 = arith.constant 0 : i32
    return %c0_i32, %arg0 : i32, i32
  }
}

</mosaic_0001>

<bundles_post_ra>
// kernel: tpu_custom_call.1
= control target key start
LH: loop header
LB: loop body
LE: loop exit
PB: predicated region body
PF: predicated region fallthrough
CT: control target
= control target key end

     0   :  { %vm89_vm0 = vcmask 261120   ;;  %v649_v5 = vmov 0   ;;  %s841_s0 = inlined_call_operand.vmem [shape: f32[16,32], index: 0, kind: input, shape index: {}]   ;;  %s842_s1 = inlined_call_operand.vmem [shape: f32[64,32], index: 1, kind: input, shape index: {}]   ;;  %s843_s2 = inlined_call_operand.vmem [shape: f32[64,1], index: 2, kind: input, shape index: {}]   ;;  %s844_s3 = inlined_call_operand.vmem [shape: f32[32,64], index: 3, kind: input, shape index: {}]   ;;  %s845_s4 = inlined_call_operand.vmem [shape: f32[32,1], index: 4, kind: input, shape index: {}]   ;;  %s846_s5 = inlined_call_operand.vmem [shape: f32[1,32], index: 5, kind: input, shape index: {}]   ;;  %s847_s6 = inlined_call_operand.vmem [shape: f32[32,1], index: 6, kind: input, shape index: {}]   ;;  %s848_s7 = inlined_call_operand.<no memory space> [shape: f32[1,1], index: 7, kind: input, shape index: {}]   ;;  %s849_s8 = inlined_call_operand.hbm [shape: f32[1,16], index: 8, kind: output, shape index: {}]  }
   0x1   :  { %v31_v0 = vld [vmem:[%s841_s0] sm:$0xff]  ;;  %v32_v1 = vld [vmem:[%s841_s0 + $0x8] sm:$0xff]  ;;  %vm712_vm1 = vmpackc.low %vm89_vm0, %vm89_vm0  ;;  %621 = vset.pattern.permute.xlu0 %v649_v5  ;;  %622 = vset.pattern.permute.xlu1 %v649_v5 }
   0x2   :  { %v33_v2 = vld [vmem:[%s842_s1] sm:$0xff]  ;;  %v708_v3 = vpack.c.bf16 %v32_v1, %v31_v0  ;;  %v43_v7 = vld [vmem:[%s843_s2 + $0x10] sm:$0xff]  ;;  %v42_v8 = vld [vmem:[%s843_s2 + $0x8] sm:$0xff] }
   0x3   :  { %549 = vmatprep.mubr.msk.f32.mxu0 %vm89_vm0, %v33_v2  ;;  %v41_v6 = vld [vmem:[%s843_s2] sm:$0xff]  ;;  %61 = vperm.xlu1 %622, %v43_v7   ;;  %v44_v9 = vld [vmem:[%s843_s2 + $0x18] sm:$0xff]  ;;  %v34_v10 = vld [vmem:[%s842_s1 + $0x8] sm:$0xff] }
   0x4   :  { %592 = vmatprep.subr.msk.bf16.mxu0 %vm712_vm1, %v708_v3  ;;  %51 = vperm.xlu0 %621, %v41_v6   ;;  %v35_v11 = vld [vmem:[%s842_s1 + $0x10] sm:$0xff]  ;;  %v45_v12 = vld [vmem:[%s843_s2 + $0x20] sm:$0xff] }
   0x5   :  { %595 = vmatpush3.bf16.xpose.msk.msra.mxu0 %vm712_vm1, %v708_v3 }
   0x7   :  { %66 = vperm.xlu1 %622, %v44_v9  }
   0x8   :  { %56 = vperm.xlu0 %621, %v42_v8  }
   0x9   :  { %14 = vsyncpa [#allocation4], 0  ;;  %v46_v13 = vld [vmem:[%s843_s2 + $0x28] sm:$0xff]  ;;  %v36_v14 = vld [vmem:[%s842_s1 + $0x18] sm:$0xff]  ;;  %vm261_vm2 = vcmask 523264   ;;  %v650_v30 = vmov 0.0|0.0  }
   0xa   :  { %v37_v15 = vld [vmem:[%s842_s1 + $0x20] sm:$0xff]  ;;  %v47_v16 = vld [vmem:[%s843_s2 + $0x30] sm:$0xff]  ;;  %v48_v17 = vld [vmem:[%s843_s2 + $0x38] sm:$0xff]  ;;  %612 = vmatprep.subr.bf16.mxu0 %v650_v30  ;;  %vm651_vm3 = vmmov 0   ;;  %v652_v31 = vmov 0.0   ;;  %vm391_vm4 = vcmask 130048  }
   0xb   :  { %76 = vperm.xlu1 %622, %v46_v13   ;;  %v38_v18 = vld [vmem:[%s842_s1 + $0x28] sm:$0xff]  ;;  %v39_v19 = vld [vmem:[%s842_s1 + $0x30] sm:$0xff]  ;;  %v237_v20 = vld [vmem:[%s845_s4] sm:$0xff]  ;;  %s653_s16 = smov [#allocation3]   ;;  %vm487_vm5 = vcmask 122880  }
   0xc   :  { %550 = vmatmul.mubr.msk.f32.vlgmr.msra.gmra.mrb[0].mxu0 %vm89_vm0, %v34_v10  ;;  %71 = vperm.xlu0 %621, %v45_v12   ;;  %v238_v21 = vld [vmem:[%s845_s4 + $0x8] sm:$0xff]  ;;  %v40_v22 = vld [vmem:[%s842_s1 + $0x38] sm:$0xff]  ;;  %v239_v23 = vld [vmem:[%s845_s4 + $0x10] sm:$0xff]  ;;  %s495_s17 = sshll.u32 %s653_s16, 4  ;;  %s496_s17 = int_to_ptr.vmem [resolvable:$true] %s495_s17 }
   0xd   :  { %552 = vmatprep.mubr.msk.f32.mxu0 %vm89_vm0, %v35_v11  ;;  %v240_v24 = vld [vmem:[%s845_s4 + $0x18] sm:$0xff]  ;;  %v363_v25 = vld [vmem:[%s847_s6] sm:$0xff]  ;;  %v364_v26 = vld [vmem:[%s847_s6 + $0x8] sm:$0xff]  ;;  %615 = vmatpush3.bf16.xpose.msk.msra.mxu0 %vm712_vm1, %v708_v3  ;;  %s625_s2 = scalar_lea.vmem %s496_s17, 16  ;;  %s629_s18 = scalar_lea.vmem %s496_s17, 32 }
   0xe   :  { %v365_v27 = vld [vmem:[%s847_s6 + $0x10] sm:$0xff]  ;;  %v366_v28 = vld [vmem:[%s847_s6 + $0x18] sm:$0xff]  ;;  %v233_v29 = vld [vmem:[%s844_s3] sm:$0xff]  ;;  %p626_p0 = scmp.ne.s32.totalorder %s496_s17, %s625_s2  ;;  %p630_p1 = scmp.lt.s32.totalorder %s496_s17, %s496_s17 }
   0xf   :  { %86 = vperm.xlu1 %622, %v48_v17   ;;  %577 = vmatprep.mubr.msk.f32.mxu1 %vm261_vm2, %v233_v29  ;;  %v405_v32 = vld [vmem:[%s846_s5] sm:$0x1]  ;;  %v234_v5 = vld [vmem:[%s844_s3 + $0x8] sm:$0xff]  ;;  %v235_v6 = vld [vmem:[%s844_s3 + $0x10] sm:$0xff]  ;;  %p631_p2 = scmp.lt.s32.totalorder %s629_s18, %s625_s2 }
  0x10   :  { %553 = vmatmul.mubr.msk.f32.gmra.mrb[2].mxu0 %vm89_vm0, %v36_v14  ;;  %81 = vperm.xlu0 %621, %v47_v16   ;;  %v236_v7 = vld [vmem:[%s844_s3 + $0x18] sm:$0xff] }
  0x11   :  { %555 = vmatprep.mubr.msk.f32.mxu0 %vm89_vm0, %v37_v15  ;;  %p632_p3 = por %p631_p2, %p630_p1 }
  0x13   :  { %248 = vperm.xlu1 %622, %v238_v21   ;;  %p633_p4 = pnand %p632_p3, %p626_p0 }
  0x14   :  { %556 = vmatmul.mubr.msk.f32.gmra.mrb[4].mxu0 %vm89_vm0, %v38_v18  ;;  %243 = vperm.xlu0 %621, %v237_v20  }
  0x15   :  { %558 = vmatprep.mubr.msk.f32.mxu0 %vm89_vm0, %v39_v19 }
  0x17   :  { %258 = vperm.xlu1 %622, %v240_v24  }
  0x18   :  { %559 = vmatmul.mubr.msk.f32.gmra.mrb[6].mxu0 %vm89_vm0, %v40_v22  ;;  %253 = vperm.xlu0 %621, %v239_v23  }
  0x19   :  { %587 = vmatprep.mubr.msk.f32.mxu0 %vm651_vm3, %v652_v31 }
  0x1b   :  { %374 = vperm.xlu1 %622, %v364_v26  }
  0x1c   :  { %369 = vperm.xlu0 %621, %v363_v25   ;;  %588 = vmatmul.mubr.msk.f32.vlgmr.msra.gmra.mrb[8].mxu0 %vm89_vm0, %v405_v32 }
  0x1f   :  { %384 = vperm.xlu1 %622, %v366_v28  }
  0x20   :  { %379 = vperm.xlu0 %621, %v365_v27  }
  0x82   :  { %v62_v34 = vpop.permute.xlu1 %61 }
  0x83   :  { %v52_v33 = vpop.permute.xlu0 %51 }
  0x86   :  { %v67_v36 = vpop.permute.xlu1 %66 }
  0x87   :  { %v57_v35 = vpop.permute.xlu0 %56 }
  0x8a   :  { %v77_v46 = vpop.permute.xlu1 %76 }
  0x8b   :  { %v72_v49 = vpop.permute.xlu0 %71 }
  0x8e   :  { %v87_v58 = vpop.permute.xlu1 %86 }
  0x8f   :  { %v82_v61 = vpop.permute.xlu0 %81 }
  0x92   :  { %v249_v11 = vpop.permute.xlu1 %248 }
  0x93   :  { %v244_v10 = vpop.permute.xlu0 %243 }
  0x96   :  { %v259_v13 = vpop.permute.xlu1 %258 }
  0x97   :  { %v254_v12 = vpop.permute.xlu0 %253 }
  0x9a   :  { %v375_v19 = vpop.permute.xlu1 %374 }
  0x9b   :  { %v370_v18 = vpop.permute.xlu0 %369 }
  0x9f   :  { %v380_v32 = vpop.permute.xlu0 %379 }
  0xdf   :  { %v551_v37 = vpop.f32.mrb[0].mxu0 }
  0xe0   :  { %v192_v38 = vadd.f32 %v551_v37, %v57_v35  ;;  %v186_v39 = vpop.f32.mrb[1].mxu0 }
  0xe1   :  { %v187_v40 = vadd.f32 %v186_v39, %v52_v33  ;;  %v385_v33 = vpop.permute.xlu1 %384 }
  0xe2   :  { %v226_v41 = vmax.f32 %v192_v38, 0.0 }
  0xe3   :  { %v225_v42 = vmax.f32 %v187_v40, 0.0  ;;  %v554_v43 = vpop.f32.mrb[2].mxu0 }
  0xe4   :  { %v202_v44 = vadd.f32 %v554_v43, %v67_v36  ;;  %v196_v45 = vpop.f32.mrb[3].mxu0 }
  0xe5   :  { %v197_v47 = vadd.f32 %v196_v45, %v62_v34  ;;  %v596_v48 = vpack.c.bf16 %v226_v41, %v225_v42 }
  0xe6   :  { %v228_v50 = vmax.f32 %v202_v44, 0.0 }
  0xe7   :  { %v227_v51 = vmax.f32 %v197_v47, 0.0  ;;  %v557_v52 = vpop.f32.mrb[4].mxu0  ;;  %597 = vmatprep.subr.bf16.mxu1 %v596_v48  ;;  %v481_v47 = vstv %s848_s7 }
  0xe8   :  { %v212_v53 = vadd.f32 %v557_v52, %v77_v46  ;;  %v206_v54 = vpop.f32.mrb[5].mxu0  ;;  %599 = vmatpush3.bf16.msra.mxu1 %v596_v48 }
  0xe9   :  { %v600_v55 = vpack.c.bf16 %v228_v50, %v227_v51  ;;  %v207_v56 = vadd.f32 %v206_v54, %v72_v49 }
  0xea   :  { %v230_v57 = vmax.f32 %v212_v53, 0.0 }
  0xeb   :  { %v229_v59 = vmax.f32 %v207_v56, 0.0  ;;  %v560_v60 = vpop.f32.mrb[6].mxu0  ;;  %601 = vmatprep.subr.bf16.mxu1 %v600_v55 }
  0xec   :  { %v222_v62 = vadd.f32 %v560_v60, %v87_v58  ;;  %v216_v63 = vpop.f32.mrb[7].mxu0  ;;  %603 = vmatpush3.bf16.msra.mxu1 %v600_v55 }
  0xed   :  { %v604_v0 = vpack.c.bf16 %v230_v57, %v229_v59  ;;  %v217_v1 = vadd.f32 %v216_v63, %v82_v61 }
  0xee   :  { %v232_v2 = vmax.f32 %v222_v62, 0.0 }
  0xef   :  { %v231_v3 = vmax.f32 %v217_v1, 0.0  ;;  %605 = vmatprep.subr.bf16.mxu1 %v604_v0  ;;  %v475_v8 = vpop.f32.mrb[8].mxu0 }
  0xf0   :  { %607 = vmatpush3.bf16.msra.mxu1 %v604_v0  ;;  %v589_v9 = vpop.f32.mrb[9].mxu0 }
  0xf1   :  { %v608_v4 = vpack.c.bf16 %v232_v2, %v231_v3 }
  0xf3   :  { %609 = vmatprep.subr.bf16.mxu1 %v608_v4 }
  0xf4   :  { %611 = vmatpush3.bf16.msra.mxu1 %v608_v4 }
  0xf7   :  { %578 = vmatmul.mubr.msk.f32.vlgmr.msra.gmra.mrb[0].mxu1 %vm261_vm2, %v234_v5 }
  0xf8   :  { %580 = vmatprep.mubr.msk.f32.mxu1 %vm261_vm2, %v235_v6 }
  0xfb   :  { %581 = vmatmul.mubr.msk.f32.gmra.mrb[2].mxu1 %vm261_vm2, %v236_v7 }
 0x1ca   :  { %v579_v14 = vpop.f32.mrb[0].mxu1 }
 0x1cb   :  { %v346_v15 = vadd.f32 %v579_v14, %v249_v11  ;;  %v340_v16 = vpop.f32.mrb[1].mxu1 }
 0x1cc   :  { %v341_v17 = vadd.f32 %v340_v16, %v244_v10 }
 0x1cd   :  { %v360_v20 = vmax.f32 %v346_v15, 0.0 }
 0x1ce   :  { %v359_v21 = vmax.f32 %v341_v17, 0.0  ;;  %v582_v22 = vpop.f32.mrb[2].mxu1 }
 0x1cf   :  { %v388_v23 = vmul.f32 %v375_v19, %v360_v20  ;;  %v356_v24 = vadd.f32 %v582_v22, %v259_v13  ;;  %v350_v25 = vpop.f32.mrb[3].mxu1 }
 0x1d0   :  { %v387_v26 = vmul.f32 %v370_v18, %v359_v21  ;;  %v351_v27 = vadd.f32 %v350_v25, %v254_v12 }
 0x1d1   :  { %v393_v28 = vsel %vm391_vm4, %v388_v23, 0.0  ;;  %v362_v29 = vmax.f32 %v356_v24, 0.0 }
 0x1d2   :  { %v392_v30 = vsel %vm391_vm4, %v387_v26, 0.0  ;;  %v361_v31 = vmax.f32 %v351_v27, 0.0 }
 0x1d3   :  { %v394_v34 = vadd.f32 %v393_v28, %v392_v30  ;;  %v390_v35 = vmul.f32 %v385_v33, %v362_v29 }
 0x1d4   :  { %v389_v36 = vmul.f32 %v380_v32, %v361_v31 }
 0x1d5   :  { %v397_v39 = vsel %vm391_vm4, %v390_v35, 0.0 }
 0x1d6   :  { %v395_v37 = vsel %vm391_vm4, %v389_v36, 0.0 }
 0x1d7   :  { %v396_v38 = vadd.f32 %v395_v37, %v394_v34 }
 0x1d9   :  { %v398_v40 = vadd.f32 %v397_v39, %v396_v38 }
 0x1db   :  { %v399_v41 = vrot.slane %v398_v40, 4 }
 0x1dd   :  { %v400_v42 = vadd.f32 %v399_v41, %v398_v40 }
 0x1df   :  { %v401_v43 = vrot.slane %v400_v42, 2 }
 0x1e1   :  { %v402_v44 = vadd.f32 %v401_v43, %v400_v42 }
 0x1e3   :  { %v403_v45 = vrot.slane %v402_v44, 1 }
 0x1e5   :  { %v404_v46 = vadd.f32 %v403_v45, %v402_v44 }
 0x1e7   :  { %v479_v48 = vadd.f32 %v475_v8, %v404_v46 }
 0x1e9   :  { %v482_v49 = vadd.f32 %v481_v47, %v479_v48 }
 0x1eb   :  { %v483_v50 = vmul.f32 0.5, %v482_v49 }
 0x1ed   :  { %623 = vtanh.f32 %v483_v50 }
 0x1f7   :  { %v624_v51 = vpop.eup %623 }
 0x1f8   :  { %v485_v52 = vmul.f32 0.5, %v624_v51 }
 0x1fa   :  { %v486_v53 = vadd.f32 0.5, %v485_v52 }
 0x1fc   :  { %488 = vst.msk [vmem:[#allocation3] sm:$0x1] %vm487_vm5, %v486_v53 }
 0x1fd   :  { %636 = shalt.err (!%p633_p4)
}
 0x1fe   :  { %s637_s20 = scalar_lea.hbm %s849_s8, 16 }
 0x1ff   :  { %p638_p5 = scmp.ne.s32.totalorder %s849_s8, %s637_s20  ;;  %p641_p6 = scmp.lt.u32.totalorder %s637_s20, %s849_s8 }
 0x201   :  { %p643_p7 = pnand %p641_p6, %p638_p5 }
 0x203   :  { %646 = shalt.err (!%p643_p7)
}
 0x204   :  { %498 = dma.vmem_to_hbm [thread:$0]  %s496_s17, 16, %s849_s8, [#allocation4]  }
 0x205   :  { %647 = dma.done.wait [#allocation4], 16  }
 0x206   :  { %648 = vsyncadd [#allocation4], 4294967280 }
 0x207   :  { %502 = vsyncpa [#allocation4], 1 }

</bundles_post_ra>
